<compile_context>
chip_gen: v6e
topology: v6e:2x2x1
jax: 0.10.0
libtpu: 0.0.40
codegen_flags: <defaults>
</compile_context>

<pallas_src>
import functools

import jax
import jax.numpy as jnp
import numpy as np
from jax.experimental import pallas as pl
from jax.experimental.pallas import tpu as pltpu


def conv1d_glu_kernel(x_ref, lh_ref, rh_ref, ss_ref,
                      wpw_ref, bpw_ref, wdw_ref, bdw_ref,
                      out_ref, *, k, pad, halo, seq_len):
    """One (batch, T-tile) block per grid step.
       x_ref  : (Tt, C)      input tile (also the residual)
       lh_ref : (halo, C)    x rows [t*Tt - halo, t*Tt), zero-filled outside [0, T)
       rh_ref : (halo, C)    x rows [(t+1)*Tt, (t+1)*Tt + halo), zero-filled likewise
       ss_ref : (1, C)       softsign(embedding_proj(emb)) for this batch element
       wpw_ref: (C, 2C), bpw_ref: (1, 2C)   fused pointwise conv [a-half | b-half]
       wdw_ref: (k, 2C), bdw_ref: (1, 2C)   fused depthwise taps / bias
       out_ref: (Tt, C)
    """
    t_tile, c = x_ref.shape
    x = x_ref[...]                                        # native dtype, straight to MXU

    # Frame the tile with its halos. `halo` and `t_tile` are multiples of 8, so this is a
    # sublane-aligned concatenate (pure layout work, no scratch traffic).
    xf = jnp.concatenate([lh_ref[...], x, rh_ref[...]], axis=0)      # (Tt + 2*halo, C)

    # Fused pointwise (1x1) conv: a single MXU matmul producing both GLU halves.
    y = jnp.dot(xf, wpw_ref[...], preferred_element_type=jnp.float32)
    y = y + bpw_ref[...].astype(jnp.float32)                         # (Tt + 2*halo, 2C)

    # The depthwise conv zero-pads its *input* (= pointwise output), so rows whose global
    # index falls outside [0, seq_len) must be exactly zero (not the pointwise bias).
    row = jax.lax.broadcasted_iota(jnp.int32, (t_tile + 2 * halo, 1), 0)
    g = pl.program_id(1) * t_tile + row - halo                       # global row index
    y = jnp.where((g >= 0) & (g < seq_len), y, 0.0)

    # Depthwise conv along T: k statically shifted in-register slices (no VMEM scratch).
    wdw = wdw_ref[...].astype(jnp.float32)                           # (k, 2C), cast once
    base = halo - pad
    acc = bdw_ref[...].astype(jnp.float32) + y[base:base + t_tile, :] * wdw[0:1, :]
    for j in range(1, k):                                            # k is small & static
        acc = acc + y[base + j:base + j + t_tile, :] * wdw[j:j + 1, :]

    # GLU gate: a-half gets the precomputed softsign(embedding projection).
    a = acc[:, :c] + ss_ref[...].astype(jnp.float32)
    b = acc[:, c:]
    out = (a * jax.nn.sigmoid(b) + x.astype(jnp.float32)) * jnp.float32(0.7071067811865476)
    out_ref[...] = out.astype(out_ref.dtype)


def _pick_t_tile(T, halo):
    # Biggest divisor of T (multiple of 8, capped at 512 to bound f32 intermediates in
    # VMEM for large d_model) that is still >= halo so halos never straddle two tiles.
    for cand in (512, 256, 128, 64, 32, 16, 8):
        if cand <= T and T % cand == 0 and cand >= halo:
            return cand
    return T


def conv1d_glu(x, emb, params, *, kernel_size, padding, t_tile=None):
    """params = (Wpw (C,2C), bpw (1,2C), Wdw (k,2C), bdw (1,2C), We (E,C), be (1,C)).
    The 2C axis is ordered [a-half | b-half], matching torch's split along channels."""
    B, T, C = x.shape
    Wpw, bpw, Wdw, bdw, We, be = params
    assert kernel_size == 2 * padding + 1, "residual add requires 'same' depthwise conv"
    assert padding >= 1, "padding must be >= 1 for this kernel"
    # TODO(synk): ragged T (not a multiple of 8) would need a padded/masked final tile.
    assert T % 8 == 0, "T must be a multiple of 8 (sublane) for aligned tiling"

    # Halo rows, rounded up to a multiple of 8 so the in-kernel concat stays aligned.
    halo = ((padding + 7) // 8) * 8
    if t_tile is None:
        t_tile = _pick_t_tile(T, halo)
    assert T % t_tile == 0 and t_tile % 8 == 0
    n_t = T // t_tile
    assert n_t == 1 or t_tile >= halo, "T tile must cover the halo when tiling T"

    # Halos built straight from x (no full padded copy of x). Out-of-range rows are zero;
    # the kernel masks their pointwise output anyway, so only shapes matter there.
    zeros_h = jnp.zeros((B, 1, halo, C), x.dtype)
    if n_t > 1:
        lsrc = x[:, t_tile - halo:T - halo].reshape(B, n_t - 1, t_tile, C)[:, :, :halo]
        rsrc = x[:, t_tile:].reshape(B, n_t - 1, t_tile, C)[:, :, :halo]
        left = jnp.concatenate([zeros_h, lsrc], axis=1)              # (B, n_t, halo, C)
        right = jnp.concatenate([rsrc, zeros_h], axis=1)             # (B, n_t, halo, C)
    else:
        left = zeros_h
        right = zeros_h

    # Hoisted embedding projection + softsign: a degenerate (1,E)@(E,C) matmul per batch
    # element is cheaper as one plain-XLA op than as a repeated in-kernel MXU pass.
    ep = jnp.dot(emb.astype(jnp.float32), We.astype(jnp.float32)) + be.astype(jnp.float32)
    ss = (ep / (1.0 + jnp.abs(ep))).astype(jnp.float32)              # (B, 1, C)

    # Keep the MXU on the activation dtype (bf16 stays bf16); accumulate in f32 in-kernel.
    Wpw_x = Wpw.astype(x.dtype)

    kern = functools.partial(conv1d_glu_kernel, k=kernel_size, pad=padding,
                             halo=halo, seq_len=T)

    return pl.pallas_call(
        kern,
        out_shape=jax.ShapeDtypeStruct((B, T, C), x.dtype),
        grid_spec=pltpu.PrefetchScalarGridSpec(
            num_scalar_prefetch=0,
            grid=(B, n_t),
            in_specs=[
                pl.BlockSpec((None, t_tile, C), lambda b, t: (b, t, 0)),         # x tile
                pl.BlockSpec((None, None, halo, C), lambda b, t: (b, t, 0, 0)),  # left halo
                pl.BlockSpec((None, None, halo, C), lambda b, t: (b, t, 0, 0)),  # right halo
                pl.BlockSpec((None, 1, C), lambda b, t: (b, 0, 0)),              # softsign
                pl.BlockSpec((C, 2 * C), lambda b, t: (0, 0)),                   # Wpw (fused)
                pl.BlockSpec((1, 2 * C), lambda b, t: (0, 0)),                   # bpw
                pl.BlockSpec((kernel_size, 2 * C), lambda b, t: (0, 0)),         # Wdw (fused)
                pl.BlockSpec((1, 2 * C), lambda b, t: (0, 0)),                   # bdw
            ],
            out_specs=pl.BlockSpec((None, t_tile, C), lambda b, t: (b, t, 0)),
        ),
        compiler_params=pltpu.CompilerParams(
            dimension_semantics=("parallel", "parallel"),
            vmem_limit_bytes=64 * 1024 * 1024,
        ),
    )(x, left, right, ss, Wpw_x, bpw, Wdw, bdw)


def conv1d_glu_reference(x, emb, params, *, kernel_size, padding):
    """Pure-JAX reference with identical semantics (for verification)."""
    Wpw, bpw, Wdw, bdw, We, be = params
    B, T, C = x.shape
    y = x @ Wpw + bpw                                    # pointwise conv -> (B, T, 2C)
    yp = jnp.pad(y, ((0, 0), (padding, padding), (0, 0)))
    acc = jnp.zeros_like(y) + bdw
    for j in range(kernel_size):                         # depthwise conv
        acc = acc + yp[:, j:j + T, :] * Wdw[j]
    a, b = acc[..., :C], acc[..., C:]
    ep = emb @ We + be                                   # (B, 1, C)
    softsign = ep / (1.0 + jnp.abs(ep))
    out = (a + softsign) * jax.nn.sigmoid(b)
    return (out + x) * jnp.sqrt(jnp.float32(0.5))


def _make_params(key, d_model, embedding_dim, kernel_size, scale=0.1):
    keys = jax.random.split(key, 6)
    # Pointwise Conv1d(d_model -> 2*d_model, k=1) weights stored matmul-style (C, 2C),
    # with out-channels ordered [a-half | b-half] like torch's split(dim=channels).
    Wpw = scale * jax.random.normal(keys[0], (d_model, 2 * d_model), jnp.float32)
    bpw = scale * jax.random.normal(keys[1], (1, 2 * d_model), jnp.float32)
    # Depthwise Conv1d(2*d_model, groups=2*d_model, k): per-channel taps (k, 2C) + bias.
    Wdw = scale * jax.random.normal(keys[2], (kernel_size, 2 * d_model), jnp.float32)
    bdw = scale * jax.random.normal(keys[3], (1, 2 * d_model), jnp.float32)
    # Linear(embedding_dim -> d_model), stored matmul-style (E, C).
    We = scale * jax.random.normal(keys[4], (embedding_dim, d_model), jnp.float32)
    be = scale * jax.random.normal(keys[5], (1, d_model), jnp.float32)
    return (Wpw, bpw, Wdw, bdw, We, be)


if __name__ == "__main__":
    key = jax.random.PRNGKey(0)

    # --- Test 1: small shapes consistent with the module's forward; explicit t_tile=8
    # exercises the T-tiling / halo path (n_t = 2).
    B, T, d_model, embedding_dim = 2, 16, 8, 32
    kernel_size, padding = 3, 1
    k1, k2, k3, key = jax.random.split(key, 4)
    x = jax.random.normal(k1, (B, T, d_model), jnp.float32)
    emb = jax.random.normal(k2, (B, 1, embedding_dim), jnp.float32)
    params = _make_params(k3, d_model, embedding_dim, kernel_size)

    out = conv1d_glu(x, emb, params, kernel_size=kernel_size, padding=padding, t_tile=8)
    out = jax.block_until_ready(out)
    ref = conv1d_glu_reference(x, emb, params, kernel_size=kernel_size, padding=padding)
    np.testing.assert_allclose(np.asarray(out), np.asarray(ref), rtol=1e-5, atol=1e-5)

    # --- Test 2: lane-aligned channels, larger T with default tiling (n_t = 3), k=5.
    B, T, d_model, embedding_dim = 2, 192, 128, 64
    kernel_size, padding = 5, 2
    k1, k2, k3, key = jax.random.split(key, 4)
    x = jax.random.normal(k1, (B, T, d_model), jnp.float32)
    emb = jax.random.normal(k2, (B, 1, embedding_dim), jnp.float32)
    params = _make_params(k3, d_model, embedding_dim, kernel_size)

    out = conv1d_glu(x, emb, params, kernel_size=kernel_size, padding=padding)
    out = jax.block_until_ready(out)
    ref = conv1d_glu_reference(x, emb, params, kernel_size=kernel_size, padding=padding)
    np.testing.assert_allclose(np.asarray(out), np.asarray(ref), rtol=2e-4, atol=2e-4)

    print("KERNEL_OK")
</pallas_src>

<mosaic_0001>
module attributes {stable_mosaic.version = 11 : i64} {
  func.func @conv1d_glu_kernel(%arg0: i32, %arg1: i32, %arg2: memref<1x8x8xf32, #tpu.memory_space<vmem>>, %arg3: memref<1x1x8x8xf32, #tpu.memory_space<vmem>>, %arg4: memref<1x1x8x8xf32, #tpu.memory_space<vmem>>, %arg5: memref<1x1x8xf32, #tpu.memory_space<vmem>>, %arg6: memref<8x16xf32, #tpu.memory_space<vmem>>, %arg7: memref<1x16xf32, #tpu.memory_space<vmem>>, %arg8: memref<3x16xf32, #tpu.memory_space<vmem>>, %arg9: memref<1x16xf32, #tpu.memory_space<vmem>>, %arg10: memref<1x8x8xf32, #tpu.memory_space<vmem>>) attributes {dimension_semantics = [#tpu.dimension_semantics<parallel>, #tpu.dimension_semantics<parallel>], iteration_bounds = array<i64: 2, 2>, scalar_prefetch = 0 : i64, scratch_operands = 0 : i64, tpu.core_type = #tpu.core_type<tc>, window_params = [{transform_indices = @transform_0, window_bounds = array<i64: 1, 8, 8>}, {transform_indices = @transform_1, window_bounds = array<i64: 1, 1, 8, 8>}, {transform_indices = @transform_2, window_bounds = array<i64: 1, 1, 8, 8>}, {transform_indices = @transform_3, window_bounds = array<i64: 1, 1, 8>}, {pipeline_mode = #tpu.pipeline_mode<synchronous>, transform_indices = @transform_4, window_bounds = array<i64: 8, 16>}, {pipeline_mode = #tpu.pipeline_mode<synchronous>, transform_indices = @transform_5, window_bounds = array<i64: 1, 16>}, {pipeline_mode = #tpu.pipeline_mode<synchronous>, transform_indices = @transform_6, window_bounds = array<i64: 3, 16>}, {pipeline_mode = #tpu.pipeline_mode<synchronous>, transform_indices = @transform_7, window_bounds = array<i64: 1, 16>}, {transform_indices = @transform_8, window_bounds = array<i64: 1, 8, 8>}]} {
    %c0 = arith.constant 0 : index
    %c0_0 = arith.constant 0 : index
    %c0_1 = arith.constant 0 : index
    %0 = vector.load %arg2[%c0, %c0_0, %c0_1] : memref<1x8x8xf32, #tpu.memory_space<vmem>>, vector<1x8x8xf32>
    %1 = vector.shape_cast %0 : vector<1x8x8xf32> to vector<8x8xf32>
    %c0_2 = arith.constant 0 : index
    %c0_3 = arith.constant 0 : index
    %c0_4 = arith.constant 0 : index
    %c0_5 = arith.constant 0 : index
    %2 = vector.load %arg3[%c0_2, %c0_3, %c0_4, %c0_5] : memref<1x1x8x8xf32, #tpu.memory_space<vmem>>, vector<1x1x8x8xf32>
    %3 = vector.shape_cast %2 : vector<1x1x8x8xf32> to vector<8x8xf32>
    %c0_6 = arith.constant 0 : index
    %c0_7 = arith.constant 0 : index
    %c0_8 = arith.constant 0 : index
    %c0_9 = arith.constant 0 : index
    %4 = vector.load %arg4[%c0_6, %c0_7, %c0_8, %c0_9] : memref<1x1x8x8xf32, #tpu.memory_space<vmem>>, vector<1x1x8x8xf32>
    %5 = vector.shape_cast %4 : vector<1x1x8x8xf32> to vector<8x8xf32>
    %6 = tpu.concatenate %3, %1, %5 in 0 : vector<8x8xf32>, vector<8x8xf32>, vector<8x8xf32> -> vector<24x8xf32>
    %c0_10 = arith.constant 0 : index
    %c0_11 = arith.constant 0 : index
    %7 = vector.load %arg6[%c0_10, %c0_11] : memref<8x16xf32, #tpu.memory_space<vmem>>, vector<8x16xf32>
    %cst = arith.constant dense<0.000000e+00> : vector<24x16xf32>
    %8 = tpu.matmul %6, %7, %cst {dimension_numbers = #tpu.dot_dimension_numbers<[1], [0], [0], [1], [0, 0, 1, 1], [], []>} : vector<24x8xf32>, vector<8x16xf32>, vector<24x16xf32> -> vector<24x16xf32>
    %c0_12 = arith.constant 0 : index
    %c0_13 = arith.constant 0 : index
    %9 = vector.load %arg7[%c0_12, %c0_13] : memref<1x16xf32, #tpu.memory_space<vmem>>, vector<1x16xf32>
    %10 = vector.broadcast %9 : vector<1x16xf32> to vector<24x16xf32>
    %11 = arith.addf %8, %10 : vector<24x16xf32>
    %12 = tpu.iota {dimensions = array<i32: 0>} : vector<24x1xi32>
    %c8_i32 = arith.constant 8 : i32
    %13 = arith.muli %arg1, %c8_i32 : i32
    %14 = vector.broadcast %13 : i32 to vector<24x1xi32>
    %15 = arith.addi %14, %12 : vector<24x1xi32>
    %c8_i32_14 = arith.constant 8 : i32
    %16 = vector.broadcast %c8_i32_14 : i32 to vector<24x1xi32>
    %17 = arith.subi %15, %16 : vector<24x1xi32>
    %c0_i32 = arith.constant 0 : i32
    %18 = vector.broadcast %c0_i32 : i32 to vector<24x1xi32>
    %19 = arith.cmpi sge, %17, %18 : vector<24x1xi32>
    %c16_i32 = arith.constant 16 : i32
    %20 = vector.broadcast %c16_i32 : i32 to vector<24x1xi32>
    %21 = arith.cmpi slt, %17, %20 : vector<24x1xi32>
    %22 = arith.andi %19, %21 : vector<24x1xi1>
    %cst_15 = arith.constant 0.000000e+00 : f32
    %23 = vector.shape_cast %22 : vector<24x1xi1> to vector<24x1xi1>
    %24 = vector.broadcast %23 : vector<24x1xi1> to vector<24x16xi1>
    %25 = vector.broadcast %cst_15 : f32 to vector<24x16xf32>
    %26 = arith.select %24, %11, %25 : vector<24x16xi1>, vector<24x16xf32>
    %c0_16 = arith.constant 0 : index
    %c0_17 = arith.constant 0 : index
    %27 = vector.load %arg8[%c0_16, %c0_17] : memref<3x16xf32, #tpu.memory_space<vmem>>, vector<3x16xf32>
    %c0_18 = arith.constant 0 : index
    %c0_19 = arith.constant 0 : index
    %28 = vector.load %arg9[%c0_18, %c0_19] : memref<1x16xf32, #tpu.memory_space<vmem>>, vector<1x16xf32>
    %29 = vector.extract_strided_slice %26 {offsets = [7, 0], sizes = [8, 16], strides = [1, 1]} : vector<24x16xf32> to vector<8x16xf32>
    %30 = vector.extract_strided_slice %27 {offsets = [0, 0], sizes = [1, 16], strides = [1, 1]} : vector<3x16xf32> to vector<1x16xf32>
    %31 = vector.broadcast %30 : vector<1x16xf32> to vector<8x16xf32>
    %32 = arith.mulf %29, %31 : vector<8x16xf32>
    %33 = vector.broadcast %28 : vector<1x16xf32> to vector<8x16xf32>
    %34 = arith.addf %33, %32 : vector<8x16xf32>
    %35 = vector.extract_strided_slice %26 {offsets = [8, 0], sizes = [8, 16], strides = [1, 1]} : vector<24x16xf32> to vector<8x16xf32>
    %36 = vector.extract_strided_slice %27 {offsets = [1, 0], sizes = [1, 16], strides = [1, 1]} : vector<3x16xf32> to vector<1x16xf32>
    %37 = vector.broadcast %36 : vector<1x16xf32> to vector<8x16xf32>
    %38 = arith.mulf %35, %37 : vector<8x16xf32>
    %39 = arith.addf %34, %38 : vector<8x16xf32>
    %40 = vector.extract_strided_slice %26 {offsets = [9, 0], sizes = [8, 16], strides = [1, 1]} : vector<24x16xf32> to vector<8x16xf32>
    %41 = vector.extract_strided_slice %27 {offsets = [2, 0], sizes = [1, 16], strides = [1, 1]} : vector<3x16xf32> to vector<1x16xf32>
    %42 = vector.broadcast %41 : vector<1x16xf32> to vector<8x16xf32>
    %43 = arith.mulf %40, %42 : vector<8x16xf32>
    %44 = arith.addf %39, %43 : vector<8x16xf32>
    %45 = vector.extract_strided_slice %44 {offsets = [0, 0], sizes = [8, 8], strides = [1, 1]} : vector<8x16xf32> to vector<8x8xf32>
    %c0_20 = arith.constant 0 : index
    %c0_21 = arith.constant 0 : index
    %c0_22 = arith.constant 0 : index
    %46 = vector.load %arg5[%c0_20, %c0_21, %c0_22] : memref<1x1x8xf32, #tpu.memory_space<vmem>>, vector<1x1x8xf32>
    %47 = vector.shape_cast %46 : vector<1x1x8xf32> to vector<1x8xf32>
    %48 = vector.broadcast %47 : vector<1x8xf32> to vector<8x8xf32>
    %49 = arith.addf %45, %48 : vector<8x8xf32>
    %50 = vector.extract_strided_slice %44 {offsets = [0, 8], sizes = [8, 8], strides = [1, 1]} : vector<8x16xf32> to vector<8x8xf32>
    %51 = arith.negf %50 : vector<8x8xf32>
    %52 = math.exp %51 : vector<8x8xf32>
    %cst_23 = arith.constant 1.000000e+00 : f32
    %53 = vector.broadcast %cst_23 : f32 to vector<8x8xf32>
    %54 = arith.addf %53, %52 : vector<8x8xf32>
    %55 = arith.divf %53, %54 : vector<8x8xf32>
    %56 = arith.mulf %49, %55 : vector<8x8xf32>
    %57 = arith.addf %56, %1 : vector<8x8xf32>
    %cst_24 = arith.constant 0.707106769 : f32
    %58 = vector.broadcast %cst_24 : f32 to vector<8x8xf32>
    %59 = arith.mulf %57, %58 : vector<8x8xf32>
    %c0_25 = arith.constant 0 : index
    %c0_26 = arith.constant 0 : index
    %c0_27 = arith.constant 0 : index
    %60 = vector.load %arg10[%c0_25, %c0_26, %c0_27] : memref<1x8x8xf32, #tpu.memory_space<vmem>>, vector<1x8x8xf32>
    %61 = vector.shape_cast %60 : vector<1x8x8xf32> to vector<8x8xf32>
    %62 = vector.shape_cast %59 : vector<8x8xf32> to vector<1x8x8xf32>
    tpu.vector_store %arg10[%c0_25, %c0_26, %c0_27], %62 {strides = array<i32>} : memref<1x8x8xf32, #tpu.memory_space<vmem>>, vector<1x8x8xf32>,
    return
  }
  func.func @transform_0(%arg0: i32, %arg1: i32) -> (i32, i32, i32) {
    %c0_i32 = arith.constant 0 : i32
    %c0_i32_0 = arith.constant 0 : i32
    return %arg0, %arg1, %c0_i32 : i32, i32, i32
  }
  func.func @transform_1(%arg0: i32, %arg1: i32) -> (i32, i32, i32, i32) {
    %c0_i32 = arith.constant 0 : i32
    %c0_i32_0 = arith.constant 0 : i32
    %c0_i32_1 = arith.constant 0 : i32
    return %arg0, %arg1, %c0_i32, %c0_i32_0 : i32, i32, i32, i32
  }
  func.func @transform_2(%arg0: i32, %arg1: i32) -> (i32, i32, i32, i32) {
    %c0_i32 = arith.constant 0 : i32
    %c0_i32_0 = arith.constant 0 : i32
    %c0_i32_1 = arith.constant 0 : i32
    return %arg0, %arg1, %c0_i32, %c0_i32_0 : i32, i32, i32, i32
  }
  func.func @transform_3(%arg0: i32, %arg1: i32) -> (i32, i32, i32) {
    %c0_i32 = arith.constant 0 : i32
    %c0_i32_0 = arith.constant 0 : i32
    %c0_i32_1 = arith.constant 0 : i32
    return %arg0, %c0_i32, %c0_i32_0 : i32, i32, i32
  }
  func.func @transform_4(%arg0: i32, %arg1: i32) -> (i32, i32) {
    %c0_i32 = arith.constant 0 : i32
    %c0_i32_0 = arith.constant 0 : i32
    %c0_i32_1 = arith.constant 0 : i32
    return %c0_i32, %c0_i32_0 : i32, i32
  }
  func.func @transform_5(%arg0: i32, %arg1: i32) -> (i32, i32) {
    %c0_i32 = arith.constant 0 : i32
    %c0_i32_0 = arith.constant 0 : i32
    %c0_i32_1 = arith.constant 0 : i32
    return %c0_i32, %c0_i32_0 : i32, i32
  }
  func.func @transform_6(%arg0: i32, %arg1: i32) -> (i32, i32) {
    %c0_i32 = arith.constant 0 : i32
    %c0_i32_0 = arith.constant 0 : i32
    %c0_i32_1 = arith.constant 0 : i32
    return %c0_i32, %c0_i32_0 : i32, i32
  }
  func.func @transform_7(%arg0: i32, %arg1: i32) -> (i32, i32) {
    %c0_i32 = arith.constant 0 : i32
    %c0_i32_0 = arith.constant 0 : i32
    %c0_i32_1 = arith.constant 0 : i32
    return %c0_i32, %c0_i32_0 : i32, i32
  }
  func.func @transform_8(%arg0: i32, %arg1: i32) -> (i32, i32, i32) {
    %c0_i32 = arith.constant 0 : i32
    %c0_i32_0 = arith.constant 0 : i32
    return %arg0, %arg1, %c0_i32 : i32, i32, i32
  }
}

</mosaic_0001>

<bundles_post_ra>
// kernel: tpu_custom_call.1
= control target key start
LH: loop header
LB: loop body
LE: loop exit
PB: predicated region body
PF: predicated region fallthrough
CT: control target
= control target key end

     0   :  { %s1217_s0 = inlined_call_operand.vmem [shape: f32[2,16,8], index: 0, kind: input, shape index: {}]   ;;  %s1218_s1 = inlined_call_operand.vmem [shape: f32[2,2,8,8], index: 1, kind: input, shape index: {}]   ;;  %s1219_s2 = inlined_call_operand.hbm [shape: f32[2,2,8,8], index: 2, kind: input, shape index: {}]   ;;  %s1220_s3 = inlined_call_operand.vmem [shape: f32[2,1,8], index: 3, kind: input, shape index: {}]   ;;  %s1221_s4 = inlined_call_operand.vmem [shape: f32[8,16], index: 4, kind: input, shape index: {}]   ;;  %s1222_s5 = inlined_call_operand.vmem [shape: f32[1,16], index: 5, kind: input, shape index: {}]   ;;  %s1223_s6 = inlined_call_operand.vmem [shape: f32[3,16], index: 6, kind: input, shape index: {}]   ;;  %s1224_s7 = inlined_call_operand.vmem [shape: f32[1,16], index: 7, kind: input, shape index: {}]   ;;  %s1225_s8 = inlined_call_operand.vmem [shape: f32[2,16,8], index: 8, kind: output, shape index: {}]  }
   0x1   :  { %1228 = sst [smem:[#allocation7_spill]] %s1220_s3 }
   0x2   :  { %1229 = sst [smem:[#allocation8_spill]] %s1224_s7 }
   0x3   :  { %1230 = sst [smem:[#allocation9_spill]] %s1225_s8 }
   0x4   :  { %13 = vsyncpa [#allocation3], 0 }
   0x5   :  { %15 = vsyncpa [#allocation3 + $0x1], 0  ;;  %s1049_s27 = smov 0   ;;  %s1051_s28 = smov 0  }
   0x6   :  { %s1053_s29 = smov 0   ;;  %s1055_s30 = smov 0  }
   0x7   :  { %s1057_s9 = smov 0   ;;  %s1059_s10 = smov 0  }
   0x8   :  { %s1061_s11 = smov 0   ;;  %s1063_s12 = smov 0  }
   0x9 LB: > { %s776_s13 = sadd.s32 4294967295, %s998_s12   ;;  %s30_s14 = sadd.s32 1, %s990_s10  ;;  %s998_s12 = sphi %s1063_s12, %s21_s12   ;;  %s994_s11 = sphi %s1061_s11, %s1247_s11   ;;  %s990_s10 = sphi %s1059_s10, %s1246_s10   ;;  %s986_s9 = sphi %s1057_s9, %s1245_s9   ;;  %s982_s30 = sphi %s1055_s30, %s1244_s30   ;;  %s978_s29 = sphi %s1053_s29, %s1243_s29   ;;  %s974_s28 = sphi %s1051_s28, %s1242_s28   ;;  %s970_s27 = sphi %s1049_s27, %s1241_s27  }
   0xa   : > { %p31_p0 = scmp.ge.s32.totalorder %s30_s14, 2  ;;  %s33_s15 = sadd.s32 1, %s994_s11 }
   0xb   : > { %s98_s16 = sadd.s32 1, %s978_s29  ;;  %p105_p1 = scmp.ne.s32.totalorder %s978_s29, %s974_s28 }
   0xc   : > { %s1249_s14 = smov (%p31_p0, %s30_s14), 0  ;;  %s1251_s15 = smov (!%p31_p0, %s33_s15), %s994_s11 }
   0xd   : > { %1231 = sst [smem:[#allocation5_spill]] %s1249_s14  ;;  %s94_s17 = ssub.s32 %s990_s10, %s1249_s14 }
   0xe   : > { %p106_p2 = scmp.eq.s32.totalorder %s998_s12, 0  ;;  %p35_p3 = scmp.ge.s32.totalorder %s1251_s15, 2 }
   0xf   : > { %p111_p4 = scmp.ne.s32.totalorder %s974_s28, %s970_s27  ;;  %p112_p6 = scmp.eq.s32.totalorder %s776_s13, 0 }
  0x10   : > { %p1100_p5 = por %p106_p2, %p105_p1  ;;  %s1253_s15 = smov (%p35_p3, %s1251_s15), 0 }
  0x11   : > { %1233 = sst [smem:[#allocation6_spill]] %s1253_s15  ;;  %p1106_p7 = por %p112_p6, %p111_p4 }
  0x12   : > { %s93_s20 = ssub.s32 %s994_s11, %s1253_s15  ;;  %p828_p8 = scmp.lt.s32.totalorder %s998_s12, 4 }
  0x13   : > { %s95_s21 = sor.u32 %s94_s17, %s93_s20  ;;  %s307_s22 = sand.u32 1, %s978_s29  }
  0x14   : > { %p96_p9 = scmp.eq.s32.totalorder %s95_s21, 0  ;;  %s780_s23 = sshll.u32 %s307_s22, 3 }
  0x15   : > { %s781_s24 = sshll.u32 %s994_s11, 1  ;;  %s311_s13 = scalar_lea.vmem [#allocation2], %s780_s23 }
  0x16   : > { %s1116_s25 = scalar_select %p96_p9, %s978_s29, %s98_s16  }
  0x17   : > { %s316_s26 = sadd.s32 %s990_s10, %s781_s24  ;;  %s320_s14 = sshll.u32 %s311_s13, 4  ;;  %s321_s14 = int_to_ptr.vmem [resolvable:$true] %s320_s14 }
  0x18   : > { %s782_s27 = sshll.u32 %s316_s26, 7  ;;  %p1126_p10 = pnand %p828_p8, %p1100_p5 }
  0x19   : > { %s318_s7 = scalar_lea.hbm %s1219_s2, %s782_s27  ;;  %p783_p11 = scmp.ge.s32.totalorder %s998_s12, 1 }
  0x1a   : > { %p331_p12 = scmp.lt.s32.totalorder %s998_s12, 5  ;;  %s308_s16 = scalar_lea.sflag [#allocation3], %s307_s22 }
  0x1b   : > { %p906_p13 = pneg %p1126_p10  ;;  %s917_s17 = scalar_lea.vmem %s321_s14, 128 }
  0x1c   : > { %p918_p0 = scmp.ne.s32.totalorder %s321_s14, %s917_s17  ;;  %s1000_s20 = smov [#allocation2]  }
  0x1d   : > { %s922_s3 = sshll.u32 %s1000_s20, 4  ;;  %s923_s3 = int_to_ptr.vmem [resolvable:$false] %s922_s3 }
  0x1e   : > { %p920_p1 = pnand %p918_p0, %p906_p13  ;;  %s924_s8 = scalar_lea.vmem %s923_s3, 256 }
  0x1f   : > { %p925_p3 = scmp.lt.s32.totalorder %s321_s14, %s923_s3  ;;  %p926_p4 = scmp.lt.s32.totalorder %s924_s8, %s917_s17 }
  0x20   : > { %p921_p2 = pneg %p920_p1 }
  0x21   : > { %p927_p5 = por %p926_p4, %p925_p3 }
  0x23   : > { %p928_p6 = pnand %p927_p5, %p921_p2 }
  0x25   : > { %931 = shalt.err (!%p928_p6)
}
  0x26   : > { %827 = dma.hbm_to_vmem [thread:$0]  (!%p1126_p10), %s318_s7, 128, %s321_s14, %s308_s16  }
  0x27   : > { %p332_p8 = pnand %p783_p11, %p331_p12 }
  0x28   : > { %s337_s18 = sand.u32 (!%p332_p8), 1, %s974_s28  }
  0x29   : > { %335 = sbr.rel (%p332_p8) target bundleno = 419 (0x1a3), region = 52  ;;  %s1141_s21 = sshll.u32 (!%p332_p8), %s337_s18, 3 }
  0x2a   : > { %s338_s22 = scalar_lea.sflag (!%p332_p8), [#allocation3], %s337_s18  ;;  %s341_s23 = scalar_lea.vmem (!%p332_p8), [#allocation2], %s1141_s21 }
  0x2e   : > { %965 = dma.done.wait (%p1106_p7), %s338_s22, 128  }
  0x2f   : > { %967 = vsyncadd (%p1106_p7), %s338_s22, 4294967168  ;;  %p396_p9 = scmp.lt.s32.totalorder %s986_s9, 1  ;;  %p398_p10 = scmp.lt.s32.totalorder %s982_s30, 1  ;;  %v1001_v0 = vmov 0.0   ;;  %vm1002_vm0 = vmmov 0   ;;  %vm434_vm1 = vcmask 64512   ;;  %v524_v5 = vlaneseq }
  0x30   : > { %809 = vmatprep.subr.mxu0 %v1001_v0  ;;  %820 = vmatprep.subr.mxu1 %v1001_v0  ;;  %v426_v1 = vld [vmem:[%s1221_s4] sm:$0xff]  ;;  %s795_s8 = sshll.u32 %s982_s30, 3  ;;  %vm588_vm11 = vcmask 1045504   ;;  %s1237_s27 = sld [smem:[#allocation7_spill]]  ;;  %vm633_vm12 = vcmask 64519   ;;  %vm635_vm13 = vcmask 63488  }
  0x31   : > { %811 = vmatprep.mubr.msk.f32.mxu0 %vm1002_vm0, %v1001_v0  ;;  %814 = vmatprep.mubr.msk.f32.mxu1 %vm1002_vm0, %v1001_v0  ;;  %s1255_s9 = smov (!%p396_p9, %s986_s9), 1  ;;  %v425_v4 = vld [vmem:[%s341_s23] sm:$0xff]  ;;  %v525_v6 = vshrl.u32 %v524_v5, 7  ;;  %v529_v7 = vstv %s795_s8  ;;  %s1238_s20 = sld [smem:[#allocation9_spill]] }
  0x32   : > { %s399_s7 = scalar_select %p398_p10, %s982_s30, 1  ;;  %810 = vmatpush3.msra.mxu0 %v426_v1  ;;  %821 = vmatpush3.msra.mxu1 %v426_v1  ;;  %v554_v16 = vld [vmem:[%s1223_s6] sm:$0x7] }
  0x33   : > { %s785_s14 = sshll.u32 %s1255_s9, 1  ;;  %v526_v8 = vadd.s32 8, %v525_v6  ;;  %v530_v9 = vadd.s32 %v529_v7, %v525_v6  ;;  %v527_v11 = vadd.s32 16, %v525_v6  ;;  %v558_v15 = vsub.s32 0, %v525_v6  ;;  %v791_v19 = vld [vmem:[%s1222_s5] ss:$0 sm:$0xff] }
  0x34   : > { %s401_s15 = sadd.s32 %s785_s14, %s399_s7  ;;  %v572_v17 = vsub.s32 1, %v525_v6  ;;  %v582_v18 = vsub.s32 2, %v525_v6  ;;  %s1236_s14 = sld [smem:[#allocation8_spill]] }
  0x35   : > { %s1157_s19 = sshll.u32 %s401_s15, 3  ;;  %v531_v10 = vadd.s32 %v529_v7, %v526_v8  ;;  %v796_v12 = vadd.s32 4294967288, %v530_v9  ;;  %v532_v14 = vadd.s32 %v529_v7, %v527_v11  ;;  %v559_v22 = vrot.slane %v554_v16, %v558_v15  ;;  %s1003_s15 = smov 120  }
  0x36   : > { %s411_s16 = scalar_lea.vmem %s1218_s1, %s1157_s19  ;;  %s403_s3 = scalar_lea.vmem %s1217_s0, %s1157_s19  ;;  %v573_v25 = vrot.slane %v554_v16, %v572_v17  ;;  %v583_v26 = vrot.slane %v554_v16, %v582_v18 }
  0x37   : > { %v424_v2 = vld [vmem:[%s411_s16] sm:$0xff]  ;;  %v797_v13 = vadd.s32 4294967288, %v531_v10  ;;  %vm536_vm2 = vcmp.ge.s32.totalorder %v796_v12, 0  ;;  %vm539_vm3 = vcmp.lt.s32.totalorder %v796_v12, 16  ;;  %v798_v20 = vadd.s32 4294967288, %v532_v14  ;;  %s414_s13 = scalar_lea.vmem %s1237_s27, %s1255_s9 }
  0x38   : > { %812 = vmatmul.mubr.msk.f32.vlgmr.msra.gmra.mxu0 %vm434_vm1, %v424_v2  ;;  %v1170_v3 = vld [vmem:[%s403_s3] sm:$0xff]  ;;  %vm542_vm6 = vmand %vm536_vm2, %vm539_vm3  ;;  %s422_s3 = scalar_lea.vmem %s1238_s20, %s1157_s19 }
  0x39   : > { %815 = vmatmul.mubr.msk.f32.vlgmr.msra.gmra.mxu1 %vm434_vm1, %v1170_v3  ;;  %vm537_vm4 = vcmp.ge.s32.totalorder %v797_v13, 0  ;;  %vm540_vm5 = vcmp.lt.s32.totalorder %v797_v13, 16  ;;  %vm538_vm8 = vcmp.ge.s32.totalorder %v798_v20, 0  ;;  %vm541_vm9 = vcmp.lt.s32.totalorder %v798_v20, 16  ;;  %v800_v60 = vld [vmem:[%s414_s13] ss:$0 sm:$0xff] }
  0x3a   : > { %817 = vmatprep.mubr.msk.f32.mxu1 %vm1002_vm0, %v1001_v0  ;;  %vm543_vm7 = vmand %vm537_vm4, %vm540_vm5  ;;  %v799_v30 = vld [vmem:[%s1236_s14] ss:$0 sm:$0xff]  ;;  %v627_v61 = vrot.slane %v1170_v3, 1 }
  0x3b   : > { %vm544_vm10 = vmand %vm538_vm8, %vm541_vm9 }
  0x3d   : > { %818 = vmatmul.mubr.msk.f32.gmra.mxu1 %vm434_vm1, %v425_v4 }
  0xf8   : > { %v510_v21 = vpop.f32.mrf.mxu0 }
  0xf9   : > { %v511_v23 = vadd.f32 %v791_v19, %v510_v21  ;;  %v515_v24 = vpop.f32.mrf.mxu1 }
  0xfa   : > { %v516_v27 = vadd.f32 %v791_v19, %v515_v24  ;;  %v813_v28 = vpop.f32.mrf.mxu0 }
  0xfb   : > { %v551_v29 = vsel %vm542_vm6, %v511_v23, 0.0  ;;  %v816_v31 = vpop.f32.mrf.mxu1 }
  0xfc   : > { %v560_v32 = vmul.f32 %v559_v22, %v551_v29  ;;  %v552_v33 = vsel %vm543_vm7, %v516_v27, 0.0 }
  0xfd   : > { %v561_v34 = vmul.f32 %v559_v22, %v552_v33  ;;  %v574_v35 = vmul.f32 %v573_v25, %v552_v33  ;;  %v584_v36 = vmul.f32 %v583_v26, %v552_v33  ;;  %v520_v37 = vpop.f32.mrf.mxu1 }
  0xfe   : > { %v568_v38 = vadd.f32 %v799_v30, %v560_v32  ;;  %v521_v39 = vadd.f32 %v791_v19, %v520_v37 }
  0xff   : > { %v576_v40 = vrot.slane %v574_v35, 1  ;;  %v819_v41 = vpop.f32.mrf.mxu1  ;;  %v569_v42 = vadd.f32 %v799_v30, %v561_v34  ;;  %v589_v45 = vrot.slane %v584_v36, 2 }
 0x100   : > { %v553_v43 = vsel %vm544_vm10, %v521_v39, 0.0 }
 0x101   : > { %v578_v44 = vadd.f32 %v576_v40, %v568_v38  ;;  %v585_v46 = vmul.f32 %v583_v26, %v553_v43  ;;  %v579_v49 = vadd.f32 %v576_v40, %v569_v42 }
 0x103   : > { %v594_v47 = vadd.f32 %v589_v45, %v578_v44  ;;  %v590_v48 = vrot.slane %v585_v46, 2 }
 0x105   : > { %v801_v50 = vmul.f32 -1.442695, %v594_v47  ;;  %v591_v51 = vsel %vm588_vm11, %v589_v45, %v590_v48  ;;  %v603_v62 = vadd.f32 %v800_v60, %v594_v47 }
 0x106   : > { %v595_v52 = vadd.f32 %v591_v51, %v579_v49 }
 0x107   : > { %896 = vpow2.f32 %v801_v50 }
 0x108   : > { %v802_v53 = vmul.f32 -1.442695, %v595_v52  ;;  %v604_v2 = vadd.f32 %v800_v60, %v595_v52 }
 0x10a   : > { %898 = vpow2.f32 %v802_v53 }
 0x114   : > { %v897_v54 = vpop.eup %896 }
 0x115   : > { %v611_v55 = vadd.f32 1.0, %v897_v54 }
 0x117   : > { %v899_v56 = vpop.eup %898  ;;  %900 = vrcp.f32 %v611_v55 }
 0x118   : > { %v612_v57 = vadd.f32 1.0, %v899_v56 }
 0x11a   : > { %902 = vrcp.f32 %v612_v57 }
 0x124   : > { %v901_v58 = vpop.eup %900 }
 0x125   : > { %619 = vrot.lane.b32.xlu0 %v901_v58, %s1003_s15 }
 0x127   : > { %v903_v59 = vpop.eup %902 }
 0x129   : > { %621 = vrot.lane.b32.xlu0 %v903_v59, %s1003_s15 }
 0x197   : > { %v620_v63 = vpop.permute.xlu0 %619 }
 0x198   : > { %v625_v0 = vmul.f32 %v620_v63, %v603_v62 }
 0x19a   : > { %v629_v1 = vadd.f32 %v627_v61, %v625_v0 }
 0x19b   : > { %v622_v4 = vpop.permute.xlu0 %621 }
 0x19c   : > { %v631_v5 = vmul.f32 0.70710677, %v629_v1  ;;  %v626_v6 = vmul.f32 %v622_v4, %v604_v2 }
 0x19e   : > { %634 = vst.msk [vmem:[%s422_s3 - $0x7] sm:$0x80] %vm633_vm12, %v631_v5  ;;  %v630_v7 = vadd.f32 %v627_v61, %v626_v6 }
 0x1a0   : > { %v632_v8 = vmul.f32 0.70710677, %v630_v7 }
 0x1a2   : > { %636 = vst.msk [vmem:[%s422_s3 + $0x1] sm:$0x7f] %vm635_vm13, %v632_v8 }
 0x1a3 PF: > { %s21_s12 = sadd.s32 1, %s998_s12   ;;  %s1239_s8 = sld [smem:[#allocation5_spill]] }
 0x1a4   : > { %p18_p7 = scmp.ge.s32.totalorder %s21_s12, 6   ;;  %s1240_s19 = sld [smem:[#allocation6_spill]] }
 0x1a5   : > { %s1241_s27 = smov %s974_s28  ;;  %s1242_s28 = smov %s978_s29 }
 0x1a6   : > { %s1243_s29 = smov %s1116_s25  ;;  %s1244_s30 = smov %s990_s10 }
 0x1a7   : > { %s1245_s9 = smov %s994_s11  ;;  %20 = sbr.rel (!%p18_p7) target bundleno = 9 (0x9), region = 101 }
 0x1a9   : > { %s1246_s10 = smov %s1239_s8 }
 0x1aa   : > { %s1247_s11 = smov %s1240_s19 }
 0x1ac   :  { %664 = vsyncpa [#allocation3], 1 }
 0x1ad   :  { %666 = vsyncpa [#allocation3 + $0x1], 1 }

</bundles_post_ra>
